<compile_context>
chip_gen: v5e
topology: v5e:2x2
jax: 0.10.0
libtpu: 0.0.40
codegen_flags: <defaults>
</compile_context>

<pallas_src>
import functools

import jax
import jax.numpy as jnp
from jax.experimental import pallas as pl
from jax.experimental.pallas import tpu as pltpu


def _round_up(x, m):
    return ((x + m - 1) // m) * m


def _default_eup_dtype():
    """bf16 EUP on v6e/v7x (~2x throughput); f32 on v5e and older (no bf16 EUP)."""
    try:
        kind = jax.devices()[0].device_kind.lower()
    except Exception:
        return jnp.float32
    if "tpu" not in kind:
        return jnp.float32
    for old in ("v2", "v3", "v4", "v5"):
        if old in kind:
            return jnp.float32
    return jnp.bfloat16


def _spectral_filter_kernel(scale_ref, sbounds_ref, resp4_ref, x_ref, out_ref,
                            *, n_bands, eup_dtype):
    """One lane-dense tile: tanh-form band mix + clamp.

    With sigmoid(z) = 0.5*(1 + tanh(z/2)) and
        scale_ref   (SMEM, (1,))         = 0.5*(|sharp|+1) / (max(eig) + 1e-8)
        sbounds_ref (SMEM, (n_bands+1,)) = 0.5*(|sharp|+1) * sorted boundaries
        resp4_ref   (SMEM, (n_bands,))   = 0.25 * sigmoid(band_responses)
    band i contributes resp4[i]*(1 + tanh(s - sb_i))*(1 - tanh(s - sb_{i+1})),
    i.e. one EUP push per boundary, shared between adjacent bands.
    """
    def _tanh(arg):
        if eup_dtype != jnp.float32:
            return jnp.tanh(arg.astype(eup_dtype)).astype(jnp.float32)
        return jnp.tanh(arg)

    s = x_ref[...].astype(jnp.float32) * scale_ref[0]
    t_lo = _tanh(s - sbounds_ref[0])
    t_hi = _tanh(s - sbounds_ref[1])
    acc = (1.0 + t_lo) * (1.0 - t_hi) * resp4_ref[0]           # band 0
    for i in range(1, n_bands):                                # tiny static unroll
        t_lo = t_hi
        t_hi = _tanh(s - sbounds_ref[i + 1])
        acc = acc + (1.0 + t_lo) * (1.0 - t_hi) * resp4_ref[i]
    out_ref[...] = jnp.clip(acc, 1e-6, 1.0).astype(out_ref.dtype)


def multi_scale_spectral_filter(eigenvalues, band_boundaries, band_responses,
                                transition_sharpness, n_bands=3, *,
                                target_block_bytes=2 << 20,
                                eup_dtype=None):
    """Pallas implementation of MultiScaleSpectralFilter.forward."""
    if eup_dtype is None:
        eup_dtype = _default_eup_dtype()

    orig_shape = eigenvalues.shape
    flat = jnp.asarray(eigenvalues).reshape(-1)
    if not jnp.issubdtype(flat.dtype, jnp.floating):
        flat = flat.astype(jnp.float32)
    n = flat.shape[0]
    itemsize = flat.dtype.itemsize

    # ---- tiny scalar parameter prep (plain JAX, O(n_bands)/O(1)) -----------
    max_e = jnp.max(flat).astype(jnp.float32) + 1e-8            # one read of orig dtype
    half_sharp = 0.5 * (jnp.abs(jnp.asarray(transition_sharpness, jnp.float32)) + 1.0)
    boundaries = jnp.concatenate([
        jnp.zeros((1,), jnp.float32),
        jnp.sort(jnp.asarray(band_boundaries, jnp.float32).reshape(-1)),
        jnp.ones((1,), jnp.float32),
    ])
    sbounds = half_sharp * boundaries                                        # (n_bands+1,)
    resp4 = 0.25 * jax.nn.sigmoid(jnp.asarray(band_responses, jnp.float32))  # (n_bands,)
    scale = jnp.reshape(half_sharp / max_e, (1,))                            # (1,)

    # ---- lane-dense 2-D view; skip the pad copy when a lane width divides n
    lane = 1024
    for cand in (1024, 512, 256, 128):
        if n % cand == 0:
            lane = cand
            break
    pad = (-n) % lane
    if pad:
        # TODO(synk): n not divisible by 128 still pays one pad copy; a fully
        # pad-free path would need 1-D blocks + masked tail stores.
        flat = jnp.pad(flat, (0, pad))
    rows = (n + pad) // lane
    x2d = flat.reshape(rows, lane)          # bitcast reshape (no copy)

    # ~target_block_bytes per block, rows multiple of 8, and >=2 grid steps
    # when possible so the "parallel" axis can shard across v7x's 2 TCs.
    # Pallas masks the ragged last row-block itself.
    max_block_rows = max(8, _round_up(target_block_bytes // (lane * itemsize), 8))
    block_rows = min(max_block_rows, _round_up(pl.cdiv(rows, 2), 8))
    grid = (pl.cdiv(rows, block_rows),)

    kernel = functools.partial(_spectral_filter_kernel,
                               n_bands=n_bands, eup_dtype=eup_dtype)

    total = rows * lane
    cost = pl.CostEstimate(
        flops=(6 * n_bands + 3) * total,
        transcendentals=(n_bands + 1) * total,
        bytes_accessed=2 * itemsize * total,
    )

    out2d = pl.pallas_call(
        kernel,
        out_shape=jax.ShapeDtypeStruct((rows, lane), flat.dtype),
        grid=grid,
        in_specs=[
            pl.BlockSpec(memory_space=pltpu.MemorySpace.SMEM),    # scale (1,)
            pl.BlockSpec(memory_space=pltpu.MemorySpace.SMEM),    # half_sharp*bounds
            pl.BlockSpec(memory_space=pltpu.MemorySpace.SMEM),    # 0.25*sigmoid(resp)
            pl.BlockSpec((block_rows, lane), lambda i: (i, 0)),   # eig tile
        ],
        out_specs=pl.BlockSpec((block_rows, lane), lambda i: (i, 0)),
        compiler_params=pltpu.CompilerParams(
            dimension_semantics=("parallel",)),
        cost_estimate=cost,
    )(scale, sbounds, resp4, x2d)

    out_flat = out2d.reshape(-1)
    if pad:
        out_flat = out_flat[:n]
    return out_flat.reshape(orig_shape)


def _reference(eigenvalues, band_boundaries, band_responses,
               transition_sharpness, n_bands=3):
    """Pure-JAX reference mirroring the PyTorch forward."""
    x = jnp.asarray(eigenvalues, jnp.float32)
    max_e = jnp.max(x) + 1e-8
    norm = x / max_e
    boundaries = jnp.concatenate([
        jnp.zeros((1,), jnp.float32),
        jnp.sort(jnp.asarray(band_boundaries, jnp.float32)),
        jnp.ones((1,), jnp.float32)])
    sharp = jnp.abs(jnp.asarray(transition_sharpness, jnp.float32)) + 1.0
    resp = jax.nn.sigmoid(jnp.asarray(band_responses, jnp.float32))
    out = jnp.zeros_like(norm)
    for i in range(n_bands):
        lw = jax.nn.sigmoid(sharp * (norm - boundaries[i]))
        rw = jax.nn.sigmoid(sharp * (boundaries[i + 1] - norm))
        out = out + lw * rw * resp[i]
    return jnp.clip(out, 1e-6, 1.0)


if __name__ == "__main__":
    n_bands = 3
    # Deterministic parameter init per the module __init__.
    band_boundaries = jnp.linspace(0.2, 0.8, n_bands - 1)       # (n_bands-1,)
    band_responses = jnp.ones((n_bands,), jnp.float32) * 0.5     # (n_bands,)

    key = jax.random.PRNGKey(0)
    default_eup = _default_eup_dtype()

    # (n, sharpness, eup_dtype, tolerance)
    cases = [
        (2048, 5.0, jnp.float32, 1e-5),   # lane-aligned, f32 EUP, tight tolerance
        (300, 5.0, jnp.float32, 1e-5),    # ragged n (pad + masked boundary block)
        (2048, 50.0, jnp.float32, 2e-5),  # very large sharpness (shared-tanh check)
        (4096 + 256, 5.0, default_eup,    # pad-free ragged (lane=256), default EUP path
         1e-5 if default_eup == jnp.float32 else 2e-2),
    ]
    for idx, (n, sharp, eup, tol) in enumerate(cases):
        k = jax.random.fold_in(key, idx)
        eigenvalues = jax.random.uniform(k, (n,), jnp.float32) * 10.0
        ts = jnp.asarray(sharp, jnp.float32)

        out = multi_scale_spectral_filter(
            eigenvalues, band_boundaries, band_responses, ts,
            n_bands=n_bands, eup_dtype=eup)
        out = jax.block_until_ready(out)

        ref = _reference(eigenvalues, band_boundaries, band_responses, ts,
                         n_bands=n_bands)
        assert out.shape == eigenvalues.shape
        assert out.dtype == eigenvalues.dtype
        assert jnp.allclose(out, ref, atol=tol, rtol=tol), f"mismatch case={idx}"

    print("KERNEL_OK")
</pallas_src>

<mosaic_0001>
module attributes {stable_mosaic.version = 11 : i64} {
  func.func @_spectral_filter_kernel(%arg0: i32, %arg1: memref<1xf32, #tpu.memory_space<smem>>, %arg2: memref<4xf32, #tpu.memory_space<smem>>, %arg3: memref<3xf32, #tpu.memory_space<smem>>, %arg4: memref<8x1024xf32, #tpu.memory_space<vmem>>, %arg5: memref<8x1024xf32, #tpu.memory_space<vmem>>) attributes {dimension_semantics = [#tpu.dimension_semantics<parallel>], iteration_bounds = array<i64: 1>, scalar_prefetch = 0 : i64, scratch_operands = 0 : i64, tpu.core_type = #tpu.core_type<tc>, window_params = [{transform_indices = @transform_0, window_bounds = array<i64: 1>}, {transform_indices = @transform_1, window_bounds = array<i64: 4>}, {transform_indices = @transform_2, window_bounds = array<i64: 3>}, {transform_indices = @transform_3, window_bounds = array<i64: 8, 1024>}, {transform_indices = @transform_4, window_bounds = array<i64: 8, 1024>}]} {
    %c0 = arith.constant 0 : index
    %c0_0 = arith.constant 0 : index
    %0 = vector.load %arg4[%c0, %c0_0] : memref<8x1024xf32, #tpu.memory_space<vmem>>, vector<8x1024xf32>
    %c0_1 = arith.constant 0 : index
    %1 = memref.load %arg1[%c0_1] : memref<1xf32, #tpu.memory_space<smem>>
    %2 = vector.broadcast %1 : f32 to vector<8x1024xf32>
    %3 = arith.mulf %0, %2 : vector<8x1024xf32>
    %c0_2 = arith.constant 0 : index
    %4 = memref.load %arg2[%c0_2] : memref<4xf32, #tpu.memory_space<smem>>
    %5 = vector.broadcast %4 : f32 to vector<8x1024xf32>
    %6 = arith.subf %3, %5 : vector<8x1024xf32>
    %7 = math.tanh %6 : vector<8x1024xf32>
    %c1 = arith.constant 1 : index
    %8 = memref.load %arg2[%c1] : memref<4xf32, #tpu.memory_space<smem>>
    %9 = vector.broadcast %8 : f32 to vector<8x1024xf32>
    %10 = arith.subf %3, %9 : vector<8x1024xf32>
    %11 = math.tanh %10 : vector<8x1024xf32>
    %cst = arith.constant 1.000000e+00 : f32
    %12 = vector.broadcast %cst : f32 to vector<8x1024xf32>
    %13 = arith.addf %12, %7 : vector<8x1024xf32>
    %cst_3 = arith.constant 1.000000e+00 : f32
    %14 = vector.broadcast %cst_3 : f32 to vector<8x1024xf32>
    %15 = arith.subf %14, %11 : vector<8x1024xf32>
    %16 = arith.mulf %13, %15 : vector<8x1024xf32>
    %c0_4 = arith.constant 0 : index
    %17 = memref.load %arg3[%c0_4] : memref<3xf32, #tpu.memory_space<smem>>
    %18 = vector.broadcast %17 : f32 to vector<8x1024xf32>
    %19 = arith.mulf %16, %18 : vector<8x1024xf32>
    %c2 = arith.constant 2 : index
    %20 = memref.load %arg2[%c2] : memref<4xf32, #tpu.memory_space<smem>>
    %21 = vector.broadcast %20 : f32 to vector<8x1024xf32>
    %22 = arith.subf %3, %21 : vector<8x1024xf32>
    %23 = math.tanh %22 : vector<8x1024xf32>
    %cst_5 = arith.constant 1.000000e+00 : f32
    %24 = vector.broadcast %cst_5 : f32 to vector<8x1024xf32>
    %25 = arith.addf %24, %11 : vector<8x1024xf32>
    %cst_6 = arith.constant 1.000000e+00 : f32
    %26 = vector.broadcast %cst_6 : f32 to vector<8x1024xf32>
    %27 = arith.subf %26, %23 : vector<8x1024xf32>
    %28 = arith.mulf %25, %27 : vector<8x1024xf32>
    %c1_7 = arith.constant 1 : index
    %29 = memref.load %arg3[%c1_7] : memref<3xf32, #tpu.memory_space<smem>>
    %30 = vector.broadcast %29 : f32 to vector<8x1024xf32>
    %31 = arith.mulf %28, %30 : vector<8x1024xf32>
    %32 = arith.addf %19, %31 : vector<8x1024xf32>
    %c3 = arith.constant 3 : index
    %33 = memref.load %arg2[%c3] : memref<4xf32, #tpu.memory_space<smem>>
    %34 = vector.broadcast %33 : f32 to vector<8x1024xf32>
    %35 = arith.subf %3, %34 : vector<8x1024xf32>
    %36 = math.tanh %35 : vector<8x1024xf32>
    %cst_8 = arith.constant 1.000000e+00 : f32
    %37 = vector.broadcast %cst_8 : f32 to vector<8x1024xf32>
    %38 = arith.addf %37, %23 : vector<8x1024xf32>
    %cst_9 = arith.constant 1.000000e+00 : f32
    %39 = vector.broadcast %cst_9 : f32 to vector<8x1024xf32>
    %40 = arith.subf %39, %36 : vector<8x1024xf32>
    %41 = arith.mulf %38, %40 : vector<8x1024xf32>
    %c2_10 = arith.constant 2 : index
    %42 = memref.load %arg3[%c2_10] : memref<3xf32, #tpu.memory_space<smem>>
    %43 = vector.broadcast %42 : f32 to vector<8x1024xf32>
    %44 = arith.mulf %41, %43 : vector<8x1024xf32>
    %45 = arith.addf %32, %44 : vector<8x1024xf32>
    %cst_11 = arith.constant 9.99999997E-7 : f32
    %cst_12 = arith.constant 1.000000e+00 : f32
    %46 = vector.broadcast %cst_11 : f32 to vector<8x1024xf32>
    %47 = arith.maximumf %46, %45 : vector<8x1024xf32>
    %48 = vector.broadcast %cst_12 : f32 to vector<8x1024xf32>
    %49 = arith.minimumf %48, %47 : vector<8x1024xf32>
    %c0_13 = arith.constant 0 : index
    %c0_14 = arith.constant 0 : index
    %50 = vector.load %arg5[%c0_13, %c0_14] : memref<8x1024xf32, #tpu.memory_space<vmem>>, vector<8x1024xf32>
    tpu.vector_store %arg5[%c0_13, %c0_14], %49 {strides = array<i32>} : memref<8x1024xf32, #tpu.memory_space<vmem>>, vector<8x1024xf32>,
    return
  }
  func.func @transform_0(%arg0: i32) -> i32 {
    %c0_i32 = arith.constant 0 : i32
    %c0_i32_0 = arith.constant 0 : i32
    return %c0_i32 : i32
  }
  func.func @transform_1(%arg0: i32) -> i32 {
    %c0_i32 = arith.constant 0 : i32
    %c0_i32_0 = arith.constant 0 : i32
    return %c0_i32 : i32
  }
  func.func @transform_2(%arg0: i32) -> i32 {
    %c0_i32 = arith.constant 0 : i32
    %c0_i32_0 = arith.constant 0 : i32
    return %c0_i32 : i32
  }
  func.func @transform_3(%arg0: i32) -> (i32, i32) {
    %c0_i32 = arith.constant 0 : i32
    %c0_i32_0 = arith.constant 0 : i32
    return %arg0, %c0_i32 : i32, i32
  }
  func.func @transform_4(%arg0: i32) -> (i32, i32) {
    %c0_i32 = arith.constant 0 : i32
    %c0_i32_0 = arith.constant 0 : i32
    return %arg0, %c0_i32 : i32, i32
  }
}

</mosaic_0001>

<bundles_post_ra>
// kernel: tpu_custom_call.1
= control target key start
LH: loop header
LB: loop body
LE: loop exit
PB: predicated region body
PF: predicated region fallthrough
CT: control target
= control target key end

     0   :  { %10 = vsyncpa [#allocation6], 0  ;;  %s639_s0 = inlined_call_operand.<no memory space> [shape: f32[1], index: 0, kind: input, shape index: {}]   ;;  %s640_s1 = inlined_call_operand.vmem [shape: f32[4], index: 1, kind: input, shape index: {}]   ;;  %s641_s2 = inlined_call_operand.vmem [shape: f32[3], index: 2, kind: input, shape index: {}]   ;;  %s642_s3 = inlined_call_operand.hbm [shape: f32[2,1024], index: 3, kind: input, shape index: {}]   ;;  %s643_s4 = inlined_call_operand.hbm [shape: f32[2,1024], index: 4, kind: output, shape index: {}]  }
   0x1   :  { %11 = vsyncpa [#allocation8], 0 }
   0x2   :  { %12 = vsyncpa [#allocation4], 0 }
   0x3   :  { %13 = vsyncpa [#allocation5], 0  ;;  %s21_s17 = sshll.u32 %s640_s1, 4  ;;  %s30_s20 = sshll.u32 %s641_s2, 4  ;;  %s22_s17 = int_to_ptr.vmem [resolvable:$true] %s21_s17  ;;  %s31_s20 = int_to_ptr.vmem [resolvable:$true] %s30_s20 }
   0x4   :  { %s468_s21 = smov [#allocation3]   ;;  %s469_s22 = smov [#allocation7]  }
   0x5   :  { %24 = dma.vmem_to_smem %s22_s17, 16, %s468_s21, [#allocation6]  }
   0x6   :  { %33 = dma.vmem_to_smem %s31_s20, 16, %s469_s22, [#allocation8]  }
   0x7   :  { %37 = vsyncadd [#allocation4], 768  ;;  %s38_s25 = sshll.u32 %s642_s3, 4  ;;  %s470_s26 = smov [#allocation9]   ;;  %s39_s25 = int_to_ptr.hbm [resolvable:$true] %s38_s25 }
   0x8   :  { %s40_s27 = sshll.u32 %s470_s26, 4  ;;  %s471_s1 = smov 256   ;;  %s41_s27 = int_to_ptr.vmem [resolvable:$true] %s40_s27 }
   0x9   :  { %s472_s28 = smov 16  }
   0xa   :  { %46 = dma.hbm_to_vmem [thread:$0]  %s39_s25, 256, %s41_s27, [#allocation4], %s471_s1, %s471_s1, %s472_s28  }
   0xb   :  { %460 = dma.done.wait [#allocation6], 16  }
   0xc   :  { %461 = vsyncadd [#allocation6], 4294967280 }
   0xd   :  { %462 = dma.done.wait [#allocation8], 16  }
   0xe   :  { %463 = vsyncadd [#allocation8], 4294967280 }
   0xf   :  { %464 = dma.done.wait [#allocation4], 1024  }
  0x10   :  { %465 = vsyncadd [#allocation4], 4294966272 }
  0x11   :  { %59 = sfence }
  0x12   :  { %v60_v0 = vld [vmem:[#allocation9] sm:$0xff]  ;;  %v514_v1 = vstv %s639_s0  ;;  %s78_s29 = sld [smem:[#allocation3]]  ;;  %v61_v2 = vld [vmem:[#allocation9 + $0x8] sm:$0xff]  ;;  %v62_v6 = vld [vmem:[#allocation9 + $0x10] sm:$0xff] }
  0x13   :  { %s313_s30 = sld [smem:[#allocation3 + $0x1]]  ;;  %v70_v3 = vmul.f32 %v514_v1, %v60_v0  ;;  %v71_v4 = vmul.f32 %v514_v1, %v61_v2  ;;  %v63_v10 = vld [vmem:[#allocation9 + $0x18] sm:$0xff]  ;;  %v64_v11 = vld [vmem:[#allocation9 + $0x20] sm:$0xff]  ;;  %v65_v13 = vld [vmem:[#allocation9 + $0x28] sm:$0xff]  ;;  %v72_v16 = vmul.f32 %v514_v1, %v62_v6 }
  0x14   :  { %s314_s5 = sld [smem:[#allocation3 + $0x2]]  ;;  %v66_v17 = vld [vmem:[#allocation9 + $0x30] sm:$0xff]  ;;  %v535_v19 = vmul.f32 %v514_v1, %v63_v10  ;;  %v538_v20 = vmul.f32 %v514_v1, %v64_v11  ;;  %v544_v23 = vmul.f32 %v514_v1, %v65_v13 }
  0x15   :  { %s138_s6 = sld [smem:[#allocation7]]  ;;  %v549_v26 = vmul.f32 %v514_v1, %v66_v17 }
  0x16   :  { %s316_s7 = sld [smem:[#allocation3 + $0x3]] }
  0x17   :  { %s520_s8 = sld [smem:[#allocation7 + $0x1]] }
  0x18   :  { %v518_v5 = vstv %s78_s29  ;;  %s525_s0 = sld [smem:[#allocation7 + $0x2]] }
  0x19   :  { %v80_v7 = vsub.f32 %v70_v3, %v518_v5  ;;  %v523_v8 = vstv %s313_s30  ;;  %v81_v9 = vsub.f32 %v71_v4, %v518_v5  ;;  %v82_v28 = vsub.f32 %v72_v16, %v518_v5 }
  0x1a   :  { %v98_v12 = vsub.f32 %v70_v3, %v523_v8  ;;  %v529_v14 = vstv %s314_s5  ;;  %v99_v15 = vsub.f32 %v71_v4, %v523_v8  ;;  %v100_v29 = vsub.f32 %v72_v16, %v523_v8 }
  0x1b   :  { %324 = vtanh.f32 %v80_v7  ;;  %v150_v18 = vsub.f32 %v70_v3, %v529_v14  ;;  %v151_v22 = vsub.f32 %v71_v4, %v529_v14  ;;  %v551_v27 = vstv %s138_s6 }
  0x1c   :  { %326 = vtanh.f32 %v98_v12  ;;  %v540_v21 = vstv %s316_s7  ;;  %v83_v31 = vsub.f32 %v535_v19, %v518_v5  ;;  %v101_v32 = vsub.f32 %v535_v19, %v523_v8 }
  0x1d   :  { %328 = vtanh.f32 %v81_v9  ;;  %v210_v24 = vsub.f32 %v70_v3, %v540_v21  ;;  %v211_v25 = vsub.f32 %v71_v4, %v540_v21  ;;  %v556_v30 = vstv %s520_s8 }
  0x1e   :  { %330 = vtanh.f32 %v150_v18  ;;  %v563_v34 = vstv %s525_s0  ;;  %v152_v35 = vsub.f32 %v72_v16, %v529_v14  ;;  %v153_v36 = vsub.f32 %v535_v19, %v529_v14 }
  0x1f   :  { %332 = vtanh.f32 %v99_v15  ;;  %v212_v39 = vsub.f32 %v72_v16, %v540_v21  ;;  %v213_v40 = vsub.f32 %v535_v19, %v540_v21  ;;  %v84_v44 = vsub.f32 %v538_v20, %v518_v5 }
  0x20   :  { %334 = vtanh.f32 %v210_v24  ;;  %v102_v47 = vsub.f32 %v538_v20, %v523_v8  ;;  %v154_v48 = vsub.f32 %v538_v20, %v529_v14  ;;  %v214_v56 = vsub.f32 %v538_v20, %v540_v21 }
  0x21   :  { %v325_v33 = vpop.eup %324  ;;  %336 = vtanh.f32 %v151_v22 }
  0x22   :  { %v327_v37 = vpop.eup %326  ;;  %v114_v38 = vadd.f32 1.0, %v325_v33  ;;  %338 = vtanh.f32 %v211_v25 }
  0x23   :  { %v329_v41 = vpop.eup %328  ;;  %v122_v42 = vsub.f32 1.0, %v327_v37  ;;  %v166_v43 = vadd.f32 1.0, %v327_v37  ;;  %340 = vtanh.f32 %v82_v28 }
  0x24   :  { %v331_v45 = vpop.eup %330  ;;  %v115_v46 = vadd.f32 1.0, %v329_v41  ;;  %342 = vtanh.f32 %v100_v29 }
  0x25   :  { %v333_v49 = vpop.eup %332  ;;  %v130_v50 = vmul.f32 %v122_v42, %v114_v38  ;;  %v174_v51 = vsub.f32 1.0, %v331_v45  ;;  %v226_v52 = vadd.f32 1.0, %v331_v45  ;;  %344 = vtanh.f32 %v152_v35 }
  0x26   :  { %v335_v53 = vpop.eup %334  ;;  %v123_v54 = vsub.f32 1.0, %v333_v49  ;;  %v167_v55 = vadd.f32 1.0, %v333_v49  ;;  %346 = vtanh.f32 %v212_v39 }
  0x27   :  { %v337_v57 = vpop.eup %336  ;;  %v140_v58 = vmul.f32 %v551_v27, %v130_v50  ;;  %v182_v59 = vmul.f32 %v174_v51, %v166_v43  ;;  %v234_v60 = vsub.f32 1.0, %v335_v53  ;;  %348 = vtanh.f32 %v83_v31 }
  0x28   :  { %v339_v61 = vpop.eup %338  ;;  %v131_v62 = vmul.f32 %v123_v54, %v115_v46  ;;  %v175_v63 = vsub.f32 1.0, %v337_v57  ;;  %v227_v0 = vadd.f32 1.0, %v337_v57  ;;  %350 = vtanh.f32 %v101_v32 }
  0x29   :  { %v341_v2 = vpop.eup %340  ;;  %v192_v3 = vmul.f32 %v556_v30, %v182_v59  ;;  %v242_v4 = vmul.f32 %v234_v60, %v226_v52  ;;  %v235_v6 = vsub.f32 1.0, %v339_v61  ;;  %352 = vtanh.f32 %v153_v36 }
  0x2a   :  { %v343_v7 = vpop.eup %342  ;;  %v141_v9 = vmul.f32 %v551_v27, %v131_v62  ;;  %v183_v10 = vmul.f32 %v175_v63, %v167_v55  ;;  %v116_v11 = vadd.f32 1.0, %v341_v2  ;;  %354 = vtanh.f32 %v213_v40 }
  0x2b   :  { %v345_v12 = vpop.eup %344  ;;  %v200_v13 = vadd.f32 %v192_v3, %v140_v58  ;;  %v252_v15 = vmul.f32 %v563_v34, %v242_v4  ;;  %v243_v16 = vmul.f32 %v235_v6, %v227_v0  ;;  %v124_v17 = vsub.f32 1.0, %v343_v7  ;;  %v67_v6 = vld [vmem:[#allocation9 + $0x38] sm:$0xff] }
  0x2c   :  { %v347_v18 = vpop.eup %346  ;;  %v193_v19 = vmul.f32 %v556_v30, %v183_v10  ;;  %v168_v22 = vadd.f32 1.0, %v343_v7  ;;  %v176_v24 = vsub.f32 1.0, %v345_v12  ;;  %v228_v25 = vadd.f32 1.0, %v345_v12 }
  0x2d   :  { %v349_v28 = vpop.eup %348  ;;  %v260_v29 = vadd.f32 %v252_v15, %v200_v13  ;;  %v253_v31 = vmul.f32 %v563_v34, %v243_v16  ;;  %v132_v32 = vmul.f32 %v124_v17, %v116_v11  ;;  %v236_v33 = vsub.f32 1.0, %v347_v18 }
  0x2e   :  { %v351_v35 = vpop.eup %350  ;;  %v201_v36 = vadd.f32 %v193_v19, %v141_v9  ;;  %v184_v37 = vmul.f32 %v176_v24, %v168_v22  ;;  %v117_v38 = vadd.f32 1.0, %v349_v28  ;;  %356 = vtanh.f32 %v84_v44 }
  0x2f   :  { %v353_v39 = vpop.eup %352  ;;  %v268_v40 = vmax.f32 %v260_v29, 1e-06  ;;  %v142_v41 = vmul.f32 %v551_v27, %v132_v32  ;;  %v244_v42 = vmul.f32 %v236_v33, %v228_v25  ;;  %v125_v43 = vsub.f32 1.0, %v351_v35 }
  0x30   :  { %v355_v45 = vpop.eup %354  ;;  %v261_v46 = vadd.f32 %v253_v31, %v201_v36  ;;  %v194_v49 = vmul.f32 %v556_v30, %v184_v37  ;;  %v169_v50 = vadd.f32 1.0, %v351_v35  ;;  %v177_v51 = vsub.f32 1.0, %v353_v39 }
  0x31   :  { %v276_v52 = vmin.f32 %v268_v40, 1.0  ;;  %v254_v53 = vmul.f32 %v563_v34, %v244_v42  ;;  %v133_v54 = vmul.f32 %v125_v43, %v117_v38  ;;  %v229_v55 = vadd.f32 1.0, %v353_v39 }
  0x32   :  { %v269_v57 = vmax.f32 %v261_v46, 1e-06  ;;  %v202_v58 = vadd.f32 %v194_v49, %v142_v41  ;;  %v185_v44 = vmul.f32 %v177_v51, %v169_v50  ;;  %v237_v59 = vsub.f32 1.0, %v355_v45 }
  0x33   :  { %284 = vst [vmem:[#allocation10] sm:$0xff] %v276_v52  ;;  %v143_v60 = vmul.f32 %v551_v27, %v133_v54  ;;  %358 = vtanh.f32 %v102_v47  ;;  %v85_v61 = vsub.f32 %v544_v23, %v518_v5  ;;  %v103_v62 = vsub.f32 %v544_v23, %v523_v8 }
  0x34   :  { %v357_v63 = vpop.eup %356  ;;  %v277_v0 = vmin.f32 %v269_v57, 1.0  ;;  %v262_v2 = vadd.f32 %v254_v53, %v202_v58  ;;  %v195_v3 = vmul.f32 %v556_v30, %v185_v44  ;;  %v245_v4 = vmul.f32 %v237_v59, %v229_v55 }
  0x35   :  { %360 = vtanh.f32 %v154_v48  ;;  %v155_v47 = vsub.f32 %v544_v23, %v529_v14  ;;  %v215_v7 = vsub.f32 %v544_v23, %v540_v21  ;;  %v86_v12 = vsub.f32 %v549_v26, %v518_v5 }
  0x36   :  { %285 = vst [vmem:[#allocation10 + $0x8] sm:$0xff] %v277_v0  ;;  %v270_v9 = vmax.f32 %v262_v2, 1e-06  ;;  %v203_v10 = vadd.f32 %v195_v3, %v143_v60  ;;  %v255_v11 = vmul.f32 %v563_v34, %v245_v4  ;;  %362 = vtanh.f32 %v214_v56 }
  0x37   :  { %364 = vtanh.f32 %v85_v61  ;;  %v77_v48 = vmul.f32 %v514_v1, %v67_v6  ;;  %v118_v16 = vadd.f32 1.0, %v357_v63  ;;  %v104_v17 = vsub.f32 %v549_v26, %v523_v8 }
  0x38   :  { %v278_v13 = vmin.f32 %v270_v9, 1.0  ;;  %v263_v15 = vadd.f32 %v255_v11, %v203_v10  ;;  %366 = vtanh.f32 %v103_v62  ;;  %v156_v18 = vsub.f32 %v549_v26, %v529_v14 }
  0x39   :  { %v359_v23 = vpop.eup %358  ;;  %368 = vtanh.f32 %v155_v47  ;;  %v216_v1 = vsub.f32 %v549_v26, %v540_v21  ;;  %v87_v24 = vsub.f32 %v77_v48, %v518_v5  ;;  %v105_v25 = vsub.f32 %v77_v48, %v523_v8 }
  0x3a   :  { %286 = vst [vmem:[#allocation10 + $0x10] sm:$0xff] %v278_v13  ;;  %v271_v20 = vmax.f32 %v263_v15, 1e-06  ;;  %v126_v56 = vsub.f32 1.0, %v359_v23  ;;  %v170_v19 = vadd.f32 1.0, %v359_v23  ;;  %370 = vtanh.f32 %v215_v7 }
  0x3b   :  { %v361_v22 = vpop.eup %360  ;;  %372 = vtanh.f32 %v86_v12  ;;  %v157_v37 = vsub.f32 %v77_v48, %v529_v14  ;;  %v217_v38 = vsub.f32 %v77_v48, %v540_v21 }
  0x3c   :  { %v363_v28 = vpop.eup %362  ;;  %v279_v29 = vmin.f32 %v271_v20, 1.0  ;;  %v134_v31 = vmul.f32 %v126_v56, %v118_v16  ;;  %v178_v32 = vsub.f32 1.0, %v361_v22  ;;  %v230_v33 = vadd.f32 1.0, %v361_v22 }
  0x3d   :  { %v365_v35 = vpop.eup %364  ;;  %v238_v36 = vsub.f32 1.0, %v363_v28  ;;  %374 = vtanh.f32 %v104_v17 }
  0x3e   :  { %v367_v39 = vpop.eup %366  ;;  %287 = vst [vmem:[#allocation10 + $0x18] sm:$0xff] %v279_v29  ;;  %v144_v26 = vmul.f32 %v551_v27, %v134_v31  ;;  %v186_v40 = vmul.f32 %v178_v32, %v170_v19  ;;  %v119_v5 = vadd.f32 1.0, %v365_v35  ;;  %376 = vtanh.f32 %v156_v18 }
  0x3f   :  { %v369_v8 = vpop.eup %368  ;;  %v246_v41 = vmul.f32 %v238_v36, %v230_v33  ;;  %v127_v42 = vsub.f32 1.0, %v367_v39  ;;  %v171_v43 = vadd.f32 1.0, %v367_v39  ;;  %378 = vtanh.f32 %v216_v1 }
  0x40   :  { %v371_v45 = vpop.eup %370  ;;  %v196_v46 = vmul.f32 %v556_v30, %v186_v40  ;;  %v179_v49 = vsub.f32 1.0, %v369_v8  ;;  %v231_v50 = vadd.f32 1.0, %v369_v8  ;;  %380 = vtanh.f32 %v87_v24 }
  0x41   :  { %v373_v14 = vpop.eup %372  ;;  %v256_v21 = vmul.f32 %v563_v34, %v246_v41  ;;  %v135_v51 = vmul.f32 %v127_v42, %v119_v5  ;;  %v239_v52 = vsub.f32 1.0, %v371_v45  ;;  %382 = vtanh.f32 %v105_v25 }
  0x42   :  { %v204_v53 = vadd.f32 %v196_v46, %v144_v26  ;;  %v187_v54 = vmul.f32 %v179_v49, %v171_v43  ;;  %v120_v55 = vadd.f32 1.0, %v373_v14  ;;  %384 = vtanh.f32 %v157_v37 }
  0x43   :  { %v375_v57 = vpop.eup %374  ;;  %v145_v58 = vmul.f32 %v551_v27, %v135_v51  ;;  %v247_v44 = vmul.f32 %v239_v52, %v231_v50  ;;  %386 = vtanh.f32 %v217_v38 }
  0x44   :  { %v377_v59 = vpop.eup %376  ;;  %v264_v60 = vadd.f32 %v256_v21, %v204_v53  ;;  %v197_v61 = vmul.f32 %v556_v30, %v187_v54  ;;  %v128_v62 = vsub.f32 1.0, %v375_v57  ;;  %v172_v63 = vadd.f32 1.0, %v375_v57 }
  0x45   :  { %v379_v0 = vpop.eup %378  ;;  %v257_v2 = vmul.f32 %v563_v34, %v247_v44  ;;  %v180_v3 = vsub.f32 1.0, %v377_v59  ;;  %v232_v4 = vadd.f32 1.0, %v377_v59 }
  0x46   :  { %v381_v6 = vpop.eup %380  ;;  %v272_v47 = vmax.f32 %v264_v60, 1e-06  ;;  %v205_v7 = vadd.f32 %v197_v61, %v145_v58  ;;  %v136_v9 = vmul.f32 %v128_v62, %v120_v55  ;;  %v240_v10 = vsub.f32 1.0, %v379_v0 }
  0x47   :  { %v383_v11 = vpop.eup %382  ;;  %v188_v12 = vmul.f32 %v180_v3, %v172_v63  ;;  %v121_v48 = vadd.f32 1.0, %v381_v6 }
  0x48   :  { %v385_v13 = vpop.eup %384  ;;  %v280_v15 = vmin.f32 %v272_v47, 1.0  ;;  %v265_v16 = vadd.f32 %v257_v2, %v205_v7  ;;  %v146_v23 = vmul.f32 %v551_v27, %v136_v9  ;;  %v248_v17 = vmul.f32 %v240_v10, %v232_v4 }
  0x49   :  { %v387_v18 = vpop.eup %386  ;;  %v198_v20 = vmul.f32 %v556_v30, %v188_v12  ;;  %v129_v56 = vsub.f32 1.0, %v383_v11  ;;  %v173_v19 = vadd.f32 1.0, %v383_v11  ;;  %v181_v22 = vsub.f32 1.0, %v385_v13 }
  0x4a   :  { %288 = vst [vmem:[#allocation10 + $0x20] sm:$0xff] %v280_v15  ;;  %v273_v1 = vmax.f32 %v265_v16, 1e-06  ;;  %v258_v24 = vmul.f32 %v563_v34, %v248_v17  ;;  %v233_v25 = vadd.f32 1.0, %v385_v13  ;;  %v241_v28 = vsub.f32 1.0, %v387_v18 }
  0x4b   :  { %v206_v29 = vadd.f32 %v198_v20, %v146_v23  ;;  %v137_v31 = vmul.f32 %v129_v56, %v121_v48  ;;  %v189_v32 = vmul.f32 %v181_v22, %v173_v19 }
  0x4c   :  { %v281_v33 = vmin.f32 %v273_v1, 1.0  ;;  %v249_v35 = vmul.f32 %v241_v28, %v233_v25 }
  0x4d   :  { %v266_v36 = vadd.f32 %v258_v24, %v206_v29  ;;  %v147_v37 = vmul.f32 %v551_v27, %v137_v31  ;;  %v199_v38 = vmul.f32 %v556_v30, %v189_v32 }
  0x4e   :  { %289 = vst [vmem:[#allocation10 + $0x28] sm:$0xff] %v281_v33  ;;  %v259_v39 = vmul.f32 %v563_v34, %v249_v35 }
  0x4f   :  { %v274_v26 = vmax.f32 %v266_v36, 1e-06  ;;  %v207_v40 = vadd.f32 %v199_v38, %v147_v37 }
  0x51   :  { %v282_v5 = vmin.f32 %v274_v26, 1.0  ;;  %v267_v8 = vadd.f32 %v259_v39, %v207_v40 }
  0x53   :  { %290 = vst [vmem:[#allocation10 + $0x30] sm:$0xff] %v282_v5  ;;  %v275_v41 = vmax.f32 %v267_v8, 1e-06 }
  0x55   :  { %v283_v42 = vmin.f32 %v275_v41, 1.0 }
  0x57   :  { %291 = vst [vmem:[#allocation10 + $0x38] sm:$0xff] %v283_v42 }
  0x58   :  { %295 = vsyncadd [#allocation5], 768  ;;  %s298_s11 = sshll.u32 %s643_s4, 4  ;;  %s473_s12 = smov [#allocation10]   ;;  %s299_s11 = int_to_ptr.hbm [resolvable:$true] %s298_s11 }
  0x59   :  { %s296_s13 = sshll.u32 %s473_s12, 4  ;;  %s297_s13 = int_to_ptr.vmem [resolvable:$true] %s296_s13 }
  0x5a   :  { %304 = dma.vmem_to_hbm [thread:$0]  %s297_s13, 256, %s299_s11, [#allocation5], %s471_s1, %s471_s1, %s472_s28  }
  0x5b   :  { %466 = dma.done.wait [#allocation5], 1024  }
  0x5c   :  { %467 = vsyncadd [#allocation5], 4294966272 }
  0x5d   :  { %309 = vsyncpa [#allocation4], 1 }
  0x5e   :  { %310 = vsyncpa [#allocation5], 1 }
  0x5f   :  { %311 = vsyncpa [#allocation6], 1 }
  0x60   :  { %312 = vsyncpa [#allocation8], 1 }

</bundles_post_ra>
